<compile_context>
chip_gen: v7x
topology: tpu7x:2x2x1
jax: 0.10.0
libtpu: 0.0.40
codegen_flags: <defaults>
</compile_context>

<pallas_src>
import functools

import numpy as np
import jax
import jax.numpy as jnp
from jax import lax
from jax.experimental import pallas as pl
from jax.experimental.pallas import tpu as pltpu


# ----------------------------- static problem sizes ------------------------ #
N     = 2                       # batch size
C_IN  = 3
C1    = 10                      # conv1 / conv2 output channels
KSZ   = 3
H_IN  = 64                      # 64x64 input -> Flatten gives 10*3*3 = 90
P1    = 15                      # pool1 output spatial size (31 -> 15)
P2    = 3                       # pool2 output spatial size (7 -> 3)
NPAD  = 8                       # batch rows padded to one f32 sublane tile
R1    = N * P1 * P1             # 450 real pool1 "pixel" rows
R1P   = 464                     # padded to a multiple of 16 (bf16 sublane tile)
R2    = 4 * (P2 * P2) * NPAD    # 288 conv2 rows: (pool2-phase, i3*3+j3, n_pad)
KK    = C_IN * KSZ * KSZ        # 27  conv1 patch length
# conv2 tap t=(ky,kx) reads pool1 pixel row (r0 + OFFS[t]) -- shift structure
# exploited so that ONE selection matrix serves all 9 taps.
_OFFS = tuple(ky * P1 + kx for ky in range(KSZ) for kx in range(KSZ))


# ----------------------- pltpu.roll direction probe ------------------------ #

def _roll_probe_kernel(x_ref, o_ref):
    o_ref[...] = pltpu.roll(x_ref[...], 1, 0)


def _probe_roll_convention():
    """Tiny one-off kernel that pins down pltpu.roll's direction.
    Returns 'np' if result[i] = x[(i - shift) % n] (jnp.roll convention)."""
    x = jnp.arange(8 * 128, dtype=jnp.float32).reshape(8, 128)
    y = np.asarray(pl.pallas_call(
        _roll_probe_kernel,
        out_shape=jax.ShapeDtypeStruct((8, 128), jnp.float32))(x))
    xn = np.asarray(x)
    if np.array_equal(y, np.roll(xn, 1, axis=0)):
        return "np"
    if np.array_equal(y, np.roll(xn, -1, axis=0)):
        return "neg"
    raise RuntimeError("unrecognised pltpu.roll semantics")


def _roll_shifts(convention):
    """Per-tap roll shifts so that rolled[i] = z[(i + OFFS[t]) % R1P]."""
    if convention == "np":                       # result[i] = x[(i - s) % n]
        return tuple((R1P - o) % R1P for o in _OFFS)
    return tuple(_OFFS)                          # result[i] = x[(i + s) % n]


# ------------------------------ fused kernel ------------------------------- #

def _cnn_fused_kernel(a1_ref, w1_ref, b1_ref, w2c_ref, b2_ref, sel_ref,
                      wf_ref, bf_ref, out_ref, *, shifts):
    # ---- conv1: all 4 pool phases in ONE K=108 / N=40 GEMM ---------------- #
    y = jnp.dot(a1_ref[...], w1_ref[...],
                preferred_element_type=jnp.float32)              # (464, 40)
    m = y[:, 0:C1]
    for ph in range(1, 4):
        m = jnp.maximum(m, y[:, ph * C1:(ph + 1) * C1])          # MaxPool2d(2)
    p1 = jnp.maximum(m + b1_ref[...], 0.0).astype(jnp.bfloat16)  # (464, 10)
    # (padding rows 450..463 hold relu(b1); they are never selected below.)

    # ---- conv2 channel mix: ONE 90-lane GEMM ------------------------------ #
    z = jnp.dot(p1, w2c_ref[...],
                preferred_element_type=jnp.float32)              # (464, 90)

    # ---- shift-and-add the 9 taps (sublane rolls on the XLU, f32 accum) --- #
    zsum = z[:, 0:C1]
    for t in range(1, KSZ * KSZ):
        zsum = zsum + pltpu.roll(z[:, t * C1:(t + 1) * C1], shifts[t], 0)

    # ---- ONE selection GEMM replaces the 9 per-tap 0/1 matmuls ------------ #
    g = jnp.dot(sel_ref[...], zsum.astype(jnp.bfloat16),
                preferred_element_type=jnp.float32)              # (288, 10)
    c2 = jnp.maximum(g + b2_ref[...], 0.0)                       # bias + ReLU

    # ---- MaxPool2d(2): max over the 4 pool-phase row blocks (72 rows each) #
    blk = (P2 * P2) * NPAD                                       # 72
    p2 = jnp.maximum(jnp.maximum(c2[0 * blk:1 * blk], c2[1 * blk:2 * blk]),
                     jnp.maximum(c2[2 * blk:3 * blk], c2[3 * blk:4 * blk]))
    # p2 stays f32 -> every 8-row slice below is tile aligned.

    # ---- Flatten + Linear(90 -> 2) + Sigmoid ------------------------------ #
    logit = jnp.dot(p2[0:NPAD], wf_ref[0], preferred_element_type=jnp.float32)
    for k in range(1, P2 * P2):
        logit = logit + jnp.dot(p2[k * NPAD:(k + 1) * NPAD], wf_ref[k],
                                preferred_element_type=jnp.float32)
    out_ref[...] = jax.nn.sigmoid(logit + bf_ref[...])           # (NPAD, 2)


# ------------------------- one-time host-side tables ----------------------- #

def _build_sel_base():
    """Base (tap ky=kx=0) 0/1 selection matrix: sel[row, r0] = 1 where row
    enumerates (pool2-phase q, spatial k=i3*3+j3, padded batch n) and
    r0 = (n*15 + 4*i3 + 2*a2)*15 + (4*j3 + 2*b2)."""
    sel = np.zeros((R2, R1P), dtype=np.float32)
    for a2 in range(2):
        for b2 in range(2):
            q = a2 * 2 + b2
            for i3 in range(P2):
                for j3 in range(P2):
                    for nn in range(N):
                        row = q * (P2 * P2 * NPAD) + (i3 * P2 + j3) * NPAD + nn
                        r0 = (nn * P1 + 4 * i3 + 2 * a2) * P1 + (4 * j3 + 2 * b2)
                        sel[row, r0] = 1.0
    return jnp.asarray(sel, dtype=jnp.bfloat16)


def prepare_params(params):
    """One-time reshape/cast of the PyTorch-layout weights to kernel layout."""
    w1, b1, w2, b2, wf, bfin = [np.asarray(p) for p in params]

    # conv1: block-diagonal weight so all 4 pool phases come out of ONE GEMM.
    w1k = w1.transpose(2, 3, 1, 0).reshape(KK, C1)               # (ky,kx,c) x co
    w1m = np.zeros((4 * KK, 4 * C1), dtype=np.float32)
    for ph in range(4):
        w1m[ph * KK:(ph + 1) * KK, ph * C1:(ph + 1) * C1] = w1k

    # conv2: 9 tap channel-mix matrices concatenated -> one 90-lane GEMM.
    w2cat = (w2.transpose(2, 3, 1, 0).reshape(KSZ * KSZ, C1, C1)
               .transpose(1, 0, 2).reshape(C1, KSZ * KSZ * C1))  # (10, 90)

    # linear: (spatial k, channel c, output o), kept in f32 for the tail.
    wf9 = wf.reshape(2, C1, P2 * P2).transpose(2, 1, 0)          # (9, 10, 2)

    return (jnp.asarray(w1m, dtype=jnp.bfloat16),
            jnp.asarray(b1.reshape(1, C1), dtype=jnp.float32),
            jnp.asarray(w2cat, dtype=jnp.bfloat16),
            jnp.asarray(b2.reshape(1, C1), dtype=jnp.float32),
            jnp.asarray(wf9, dtype=jnp.float32),
            jnp.asarray(bfin.reshape(1, 2), dtype=jnp.float32))


# ------------------------------- forward pass ------------------------------ #

def _build_a1(x):
    """Phase-decomposed im2col for conv1 built from 36 strided slices (no
    generic gather).  Rows r = (n*15 + i1)*15 + j1 (zero padded to 464),
    columns ordered (pool-phase a*2+b, ky, kx, c)  ->  shape (464, 108)."""
    xt = jnp.transpose(x, (0, 2, 3, 1))                          # NHWC
    phase_blocks = []
    for a in range(2):
        for b in range(2):
            taps = []
            for ky in range(KSZ):
                for kx in range(KSZ):
                    y0, x0 = 2 * a + ky, 2 * b + kx
                    s = lax.slice(xt, (0, y0, x0, 0),
                                  (N, y0 + 4 * (P1 - 1) + 1,
                                   x0 + 4 * (P1 - 1) + 1, C_IN),
                                  (1, 4, 4, 1))                  # (N,15,15,3)
                    taps.append(s)
            blk = jnp.stack(taps, axis=3).reshape(R1, KK)        # (450, 27)
            phase_blocks.append(blk)
    a1 = jnp.concatenate(phase_blocks, axis=1)                   # (450, 108)
    a1 = jnp.pad(a1, ((0, R1P - R1), (0, 0)))                    # explicit zeros
    return a1.astype(jnp.bfloat16)


def cnn_forward(x, prep, sel, shifts):
    w1m, b1r, w2cat, b2r, wf9, bfr = prep
    a1 = _build_a1(x)                                            # (464, 108) bf16
    out = pl.pallas_call(
        functools.partial(_cnn_fused_kernel, shifts=shifts),
        out_shape=jax.ShapeDtypeStruct((NPAD, 2), jnp.float32),
        grid=(1,),
        in_specs=[
            pl.BlockSpec((R1P, 4 * KK), lambda i: (0, 0)),
            pl.BlockSpec((4 * KK, 4 * C1), lambda i: (0, 0)),
            pl.BlockSpec((1, C1), lambda i: (0, 0)),
            pl.BlockSpec((C1, KSZ * KSZ * C1), lambda i: (0, 0)),
            pl.BlockSpec((1, C1), lambda i: (0, 0)),
            pl.BlockSpec((R2, R1P), lambda i: (0, 0)),
            pl.BlockSpec((P2 * P2, C1, 2), lambda i: (0, 0, 0)),
            pl.BlockSpec((1, 2), lambda i: (0, 0)),
        ],
        out_specs=pl.BlockSpec((NPAD, 2), lambda i: (0, 0)),
        compiler_params=pltpu.CompilerParams(
            dimension_semantics=("arbitrary",)),
    )(a1, w1m, b1r, w2cat, b2r, sel, wf9, bfr)
    return out[:N]          # drop padded batch rows (2..7 carry garbage)


# ---------------------------- params & reference --------------------------- #

def init_params(key):
    ks = jax.random.split(key, 6)

    def u(k, shape, fan_in):
        bound = 1.0 / np.sqrt(fan_in)
        return jax.random.uniform(k, shape, jnp.float32, -bound, bound)

    w1 = u(ks[0], (C1, C_IN, KSZ, KSZ), C_IN * 9)
    b1 = u(ks[1], (C1,), C_IN * 9)
    w2 = u(ks[2], (C1, C1, KSZ, KSZ), C1 * 9)
    b2 = u(ks[3], (C1,), C1 * 9)
    wf = u(ks[4], (2, 90), 90)       # PyTorch Linear weight: (out, in)
    bf = u(ks[5], (2,), 90)
    return (w1, b1, w2, b2, wf, bf)


def ref_forward(x, params):
    """Pure-JAX reference mirroring the PyTorch forward."""
    w1, b1, w2, b2, wf, bfin = params
    dn = ("NCHW", "OIHW", "NCHW")
    y = lax.conv_general_dilated(x, w1, (2, 2), "VALID", dimension_numbers=dn)
    y = jax.nn.relu(y + b1[None, :, None, None])
    y = lax.reduce_window(y, -jnp.inf, lax.max, (1, 1, 2, 2), (1, 1, 2, 2), "VALID")
    y = lax.conv_general_dilated(y, w2, (2, 2), "VALID", dimension_numbers=dn)
    y = jax.nn.relu(y + b2[None, :, None, None])
    y = lax.reduce_window(y, -jnp.inf, lax.max, (1, 1, 2, 2), (1, 1, 2, 2), "VALID")
    y = y.reshape(y.shape[0], -1)
    return jax.nn.sigmoid(y @ wf.T + bfin)


if __name__ == "__main__":
    key = jax.random.PRNGKey(0)
    kx_, kp = jax.random.split(key)
    # 64x64 input is what makes Flatten produce 90 features (10 * 3 * 3).
    x = jax.random.normal(kx_, (N, C_IN, H_IN, H_IN), jnp.float32)
    params = init_params(kp)

    prep = prepare_params(params)            # one-time weight layout/cast
    sel = _build_sel_base()                  # one-time base selection table
    shifts = _roll_shifts(_probe_roll_convention())   # static roll amounts

    fwd = jax.jit(cnn_forward, static_argnames=("shifts",))
    out = jax.block_until_ready(fwd(x, prep, sel, shifts=shifts))

    ref = ref_forward(x, params)
    assert out.shape == (N, 2), out.shape
    np.testing.assert_allclose(np.asarray(out), np.asarray(ref),
                               atol=2e-2, rtol=2e-2)
    print("KERNEL_OK")
</pallas_src>

<mosaic_0001>
module attributes {stable_mosaic.version = 11 : i64} {
  func.func @_roll_probe_kernel(%arg0: memref<8x128xf32, #tpu.memory_space<vmem>>, %arg1: memref<8x128xf32, #tpu.memory_space<vmem>>) attributes {dimension_semantics = [], scalar_prefetch = 0 : i64, scratch_operands = 0 : i64, tpu.core_type = #tpu.core_type<tc>} {
    %c0 = arith.constant 0 : index
    %c0_0 = arith.constant 0 : index
    %0 = vector.load %arg0[%c0, %c0_0] : memref<8x128xf32, #tpu.memory_space<vmem>>, vector<8x128xf32>
    %c1_i32 = arith.constant 1 : i32
    %1 = tpu.dynamic_rotate %0 by %c1_i32 dim 0 : vector<8x128xf32>, i32 -> vector<8x128xf32>
    %c0_1 = arith.constant 0 : index
    %c0_2 = arith.constant 0 : index
    %2 = vector.load %arg1[%c0_1, %c0_2] : memref<8x128xf32, #tpu.memory_space<vmem>>, vector<8x128xf32>
    tpu.vector_store %arg1[%c0_1, %c0_2], %1 {strides = array<i32>} : memref<8x128xf32, #tpu.memory_space<vmem>>, vector<8x128xf32>,
    return
  }
}

</mosaic_0001>

<bundles_post_ra>
// kernel: tpu_custom_call.1
= control target key start
LH: loop header
LB: loop body
LE: loop exit
PB: predicated region body
PF: predicated region fallthrough
CT: control target
= control target key end

     0   :  { %6 = vsyncpa [#allocation3], 0  ;;  %s125_s0 = inlined_call_operand.hbm [shape: f32[8,128], index: 0, kind: input, shape index: {}]   ;;  %s126_s1 = inlined_call_operand.hbm [shape: f32[8,128], index: 1, kind: output, shape index: {}]  }
   0x1   :  { %7 = vsyncpa [#allocation4], 0  ;;  %s89_s6 = smov [#allocation2]   ;;  %s41_s10 = scalar_lea.hbm %s125_s0, 128 }
   0x2   :  { %s14_s7 = sshll.u32 %s89_s6, 4  ;;  %p42_p0 = scmp.ne.s32.totalorder %s125_s0, %s41_s10  ;;  %s15_s7 = int_to_ptr.vmem [resolvable:$true] %s14_s7 }
   0x3   :  { %p45_p1 = scmp.lt.u32.totalorder %s41_s10, %s125_s0 }
   0x5   :  { %p47_p2 = pnand %p45_p1, %p42_p0 }
   0x7   :  { %50 = shalt.err (!%p47_p2)
}
   0x8   :  { %s51_s15 = scalar_lea.vmem %s15_s7, 128  ;;  %p56_p4 = scmp.lt.s32.totalorder %s15_s7, %s15_s7 }
   0x9   :  { %p52_p3 = scmp.ne.s32.totalorder %s15_s7, %s51_s15  ;;  %p57_p5 = scmp.lt.s32.totalorder %s51_s15, %s51_s15 }
   0xb   :  { %p58_p6 = por %p57_p5, %p56_p4 }
   0xd   :  { %p59_p7 = pnand %p58_p6, %p52_p3 }
   0xf   :  { %62 = shalt.err (!%p59_p7)
}
  0x10   :  { %17 = dma.hbm_to_vmem [thread:$0]  %s125_s0, 128, %s15_s7, [#allocation3]  }
  0x11   :  { %85 = dma.done.wait [#allocation3], 128  }
  0x12   :  { %86 = vsyncadd [#allocation3], 4294967168  ;;  %s90_s18 = smov [#allocation5]   ;;  %v21_v0 = vld [vmem:[#allocation2] sm:$0xff] }
  0x13   :  { %s30_s19 = sshll.u32 %s90_s18, 4  ;;  %v22_v1 = vrot.slane %v21_v0, 7  ;;  %s31_s19 = int_to_ptr.vmem [resolvable:$true] %s30_s19 }
  0x14   :  { %s63_s20 = scalar_lea.vmem %s31_s19, 128  ;;  %p68_p9 = scmp.lt.s32.totalorder %s31_s19, %s31_s19 }
  0x15   :  { %23 = vst [vmem:[#allocation5] sm:$0xff] %v22_v1  ;;  %p64_p8 = scmp.ne.s32.totalorder %s31_s19, %s63_s20  ;;  %p69_p10 = scmp.lt.s32.totalorder %s63_s20, %s63_s20 }
  0x17   :  { %p70_p11 = por %p69_p10, %p68_p9 }
  0x19   :  { %p71_p12 = pnand %p70_p11, %p64_p8 }
  0x1b   :  { %74 = shalt.err (!%p71_p12)
}
  0x1c   :  { %s75_s23 = scalar_lea.hbm %s126_s1, 128 }
  0x1d   :  { %p76_p13 = scmp.ne.s32.totalorder %s126_s1, %s75_s23  ;;  %p79_p0 = scmp.lt.u32.totalorder %s75_s23, %s126_s1 }
  0x1f   :  { %p81_p1 = pnand %p79_p0, %p76_p13 }
  0x21   :  { %84 = shalt.err (!%p81_p1)
}
  0x22   :  { %33 = dma.vmem_to_hbm [thread:$0]  %s31_s19, 128, %s126_s1, [#allocation4]  }
  0x23   :  { %87 = dma.done.wait [#allocation4], 128  }
  0x24   :  { %88 = vsyncadd [#allocation4], 4294967168 }
  0x25   :  { %37 = vsyncpa [#allocation3], 1 }
  0x26   :  { %38 = vsyncpa [#allocation4], 1 }

</bundles_post_ra>
